<compile_context>
chip_gen: v7x
topology: tpu7x:2x2x1
jax: 0.10.0
libtpu: 0.0.40
codegen_flags: <defaults>
</compile_context>

<pallas_src>
import functools

import jax
import jax.numpy as jnp
from jax.experimental import pallas as pl
from jax.experimental.pallas import tpu as pltpu


def bilstm_kernel(x_ref, wih_ref, whh_ref, b_ref, len_ref, out_ref, gx_ref):
    """Fused fw+bw single-layer LSTM over a padded batch; whole sequence in one call.

    x_ref   : (T*B, D)   time-major flattened inputs (row index = t*B + b), bf16
    wih_ref : (D, 8H)    fused input->hidden weights, gate-major cols [i|f|g|o], each [fw|bw],
                         with i/f/o columns pre-scaled by 0.5 (sigmoid identity), bf16
    whh_ref : (2H, 8H)   block-diagonal hidden->hidden weights (rows: [h_fw | h_bw]),
                         same column order/scaling, bf16
    b_ref   : (1, 8H)    b_ih + b_hh per direction, same column order/scaling, f32
    len_ref : (B, 1)     int32 sequence lengths
    out_ref : (T, B, 2H) per-step hidden outputs [h_fw | h_bw], time-major, f32
    gx_ref  : (T*B, 8H)  VMEM scratch for the hoisted input projection, f32
    """
    T, B, H2 = out_ref.shape
    G = 4 * H2

    # Hoisted input projection: one MXU matmul (bf16 operands, f32 accumulate) for all steps
    # and both directions; bias added once here.
    gx_ref[...] = (jnp.dot(x_ref[...], wih_ref[...],
                           preferred_element_type=jnp.float32) + b_ref[...])

    whh = whh_ref[...]                                        # (2H, 8H) bf16

    # Post-tanh affine constants (hoisted): g gate (cols [2*H2, 3*H2)) -> (1, 0) i.e. plain tanh;
    # i/f/o gates (weights pre-scaled by 0.5) -> (0.5, 0.5), i.e. exact sigmoid.
    col = jax.lax.broadcasted_iota(jnp.int32, (1, G), 1)
    is_g = jnp.logical_and(col >= 2 * H2, col < 3 * H2)
    alpha = jnp.where(is_g, jnp.float32(1.0), jnp.float32(0.5))
    beta = jnp.where(is_g, jnp.float32(0.0), jnp.float32(0.5))

    # Validity mask, hoisted out of the recurrence: mask[b, t] = (t < len[b]).
    lens = len_ref[...]                                       # (B, 1) int32
    t_idx = jax.lax.broadcasted_iota(jnp.int32, (B, T), 1)
    mask = (t_idx < lens).astype(jnp.float32)                 # (B, T)

    h = jnp.zeros((B, H2), jnp.float32)                       # [h_fw | h_bw]
    c = jnp.zeros((B, H2), jnp.float32)

    for t in range(T):                                        # static unroll (T is small)
        # Contiguous time-major read: rows [t*B, (t+1)*B) of the hoisted projection.
        gx_t = gx_ref[pl.ds(t * B, B), :]                     # (B, 8H) f32
        gates = gx_t + jnp.dot(h.astype(jnp.bfloat16), whh,
                               preferred_element_type=jnp.float32)

        # Single full-width tanh + broadcast FMA implements sigmoid for i/f/o, tanh for g.
        act = alpha * jnp.tanh(gates) + beta                  # (B, 8H)

        i_g = act[:, 0 * H2:1 * H2]
        f_g = act[:, 1 * H2:2 * H2]
        g_g = act[:, 2 * H2:3 * H2]
        o_g = act[:, 3 * H2:4 * H2]

        c_new = f_g * c + i_g * g_g
        h_new = o_g * jnp.tanh(c_new)

        # pack_padded_sequence semantics: padded steps never update the state;
        # pad_packed_sequence puts zeros at padded output positions.
        m = mask[:, t:t + 1]                                  # (B, 1) in {0, 1}
        notm = 1.0 - m
        h_m = m * h_new                                       # reused for output + state blend
        c = m * c_new + notm * c
        h = h_m + notm * h

        out_ref[t] = h_m.astype(out_ref.dtype)                # one contiguous (B, 2H) store


def pallas_bilstm(x_tm, wih, whh, bias, lens2d, *, B, T, H):
    """x_tm:(T*B,D) bf16, wih:(D,8H) bf16, whh:(2H,8H) bf16, bias:(1,8H) f32, lens2d:(B,1) int32
    -> (T, B, 2H) f32 time-major combined [fw|bw] outputs."""
    D = x_tm.shape[1]
    H2 = 2 * H
    return pl.pallas_call(
        bilstm_kernel,
        out_shape=jax.ShapeDtypeStruct((T, B, H2), jnp.float32),
        grid_spec=pltpu.PrefetchScalarGridSpec(
            num_scalar_prefetch=0,
            grid=(1,),                                        # whole recurrence inside one step
            in_specs=[
                pl.BlockSpec((T * B, D), lambda i: (0, 0)),
                pl.BlockSpec((D, 4 * H2), lambda i: (0, 0)),
                pl.BlockSpec((H2, 4 * H2), lambda i: (0, 0)),
                pl.BlockSpec((1, 4 * H2), lambda i: (0, 0)),
                pl.BlockSpec((B, 1), lambda i: (0, 0)),
            ],
            out_specs=pl.BlockSpec((T, B, H2), lambda i: (0, 0, 0)),
            scratch_shapes=[
                # Hoisted gate projection; f32 for full pre-activation precision (footprint tiny).
                # TODO(synk): switch to bf16 / T-chunked if B*T or H scale up (v7x 64 MiB VMEM).
                pltpu.VMEM((T * B, 4 * H2), jnp.float32),
            ],
        ),
        compiler_params=pltpu.CompilerParams(
            dimension_semantics=("arbitrary",),
        ),
    )(x_tm, wih, whh, bias, lens2d)


# ---------------------------------------------------------------------------
# WordSequence1 (simplified) in JAX, with the fused LSTM hot path in Pallas.
# ---------------------------------------------------------------------------

def init_params(key, vocab_size, word_emb_dim, feature_vocab, feature_emb_dim,
                input_size, lstm_hidden):
    ks = jax.random.split(key, 10)
    scale = 1.0 / jnp.sqrt(jnp.float32(lstm_hidden))

    def u(k, shape, s):
        return jax.random.uniform(k, shape, jnp.float32, -s, s)

    return {
        "word_emb": u(ks[0], (vocab_size, word_emb_dim), 0.1),
        "feat_emb": u(ks[1], (feature_vocab, feature_emb_dim), 0.1),
        # forward-direction LSTM (nn.LSTM gate order: i, f, g, o)
        "fw_w_ih": u(ks[2], (4 * lstm_hidden, input_size), scale),
        "fw_w_hh": u(ks[3], (4 * lstm_hidden, lstm_hidden), scale),
        "fw_b_ih": u(ks[4], (4 * lstm_hidden,), scale),
        "fw_b_hh": u(ks[5], (4 * lstm_hidden,), scale),
        # "backward" LSTM (same input, independent weights — as in the module)
        "bw_w_ih": u(ks[6], (4 * lstm_hidden, input_size), scale),
        "bw_w_hh": u(ks[7], (4 * lstm_hidden, lstm_hidden), scale),
        "bw_b_ih": u(ks[8], (4 * lstm_hidden,), scale),
        "bw_b_hh": u(ks[9], (4 * lstm_hidden,), scale),
    }


def _interleave_gates(a, b, H):
    """a, b: (K, 4H) with column gate blocks [i|f|g|o] -> (K, 8H) with per-gate [fw|bw]."""
    cols = []
    for g in range(4):
        cols.append(a[:, g * H:(g + 1) * H])
        cols.append(b[:, g * H:(g + 1) * H])
    return jnp.concatenate(cols, axis=1)


def _fold_sigmoid_half(w, H):
    """Scale i/f/o gate column blocks (each 2H wide) by 0.5 (sigmoid(x)=0.5*tanh(0.5x)+0.5)."""
    H2 = 2 * H
    scale = jnp.concatenate([
        jnp.full((2 * H2,), 0.5, jnp.float32),   # i, f
        jnp.full((H2,), 1.0, jnp.float32),       # g
        jnp.full((H2,), 0.5, jnp.float32),       # o
    ])
    return w * scale[None, :]


def word_sequence1_forward(params, word_inputs, feature_inputs, word_seq_lengths):
    """Returns (feature_out_forward, feature_out_backward), each (B, T, lstm_hidden)."""
    B, T = word_inputs.shape
    H = params["fw_w_hh"].shape[1]

    # WordRep glue: embedding lookups + concat -> (B, T, D)
    w_emb = jnp.take(params["word_emb"], word_inputs, axis=0)
    f_emb = jnp.take(params["feat_emb"], feature_inputs[0], axis=0)
    word_represent = jnp.concatenate([w_emb, f_emb], axis=-1).astype(jnp.float32)
    D = word_represent.shape[-1]

    # Fuse the two directions' weights (constant-folded under jit since params are constants).
    wih = _interleave_gates(params["fw_w_ih"].T, params["bw_w_ih"].T, H)           # (D, 8H)
    zeros = jnp.zeros((H, 4 * H), jnp.float32)
    whh = jnp.concatenate(
        [_interleave_gates(params["fw_w_hh"].T, zeros, H),
         _interleave_gates(zeros, params["bw_w_hh"].T, H)], axis=0)                # (2H, 8H)
    bias = _interleave_gates((params["fw_b_ih"] + params["fw_b_hh"])[None, :],
                             (params["bw_b_ih"] + params["bw_b_hh"])[None, :], H)  # (1, 8H)

    # Fold sigmoid 0.5 pre-scale into i/f/o columns; bf16 MXU operands (f32 accumulate in-kernel).
    wih = _fold_sigmoid_half(wih, H).astype(jnp.bfloat16)
    whh = _fold_sigmoid_half(whh, H).astype(jnp.bfloat16)
    bias = _fold_sigmoid_half(bias, H)                                             # stays f32

    # Time-major flattened input: row t*B + b (one-time 64x64 transpose, off the critical path).
    x_tm = word_represent.transpose(1, 0, 2).reshape(T * B, D).astype(jnp.bfloat16)
    lens2d = word_seq_lengths.astype(jnp.int32).reshape(B, 1)

    out_tm = pallas_bilstm(x_tm, wih, whh, bias, lens2d, B=B, T=T, H=H)            # (T, B, 2H)

    # Split directions and restore batch-first layout in XLA (trivial at these sizes).
    out_fw = out_tm[:, :, :H].transpose(1, 0, 2)
    out_bw = out_tm[:, :, H:].transpose(1, 0, 2)
    # self.droplstm in eval mode == identity
    return out_fw, out_bw


if __name__ == "__main__":
    # Hyperparameters implied by the module (small, TPU-friendly sizes).
    B, T = 8, 8
    vocab_size, word_emb_dim = 50, 48
    feature_vocab, feature_emb_dim = 10, 16
    input_size = word_emb_dim + feature_emb_dim              # 64
    HP_hidden_dim = 64
    lstm_hidden = HP_hidden_dim // 2                         # bilstm_flag=True -> 32

    key = jax.random.PRNGKey(0)
    k_par, k_w, k_f, k_len = jax.random.split(key, 4)

    params = init_params(k_par, vocab_size, word_emb_dim, feature_vocab,
                         feature_emb_dim, input_size, lstm_hidden)

    word_inputs = jax.random.randint(k_w, (B, T), 0, vocab_size, dtype=jnp.int32)
    feature_inputs = [jax.random.randint(k_f, (B, T), 0, feature_vocab, dtype=jnp.int32)]
    # pack_padded_sequence expects sorted (decreasing) lengths.
    word_seq_lengths = jnp.sort(
        jax.random.randint(k_len, (B,), 1, T + 1, dtype=jnp.int32))[::-1]

    fwd_fn = jax.jit(functools.partial(word_sequence1_forward, params))
    out_fw, out_bw = fwd_fn(word_inputs, feature_inputs, word_seq_lengths)
    jax.block_until_ready((out_fw, out_bw))

    assert out_fw.shape == (B, T, lstm_hidden)
    assert out_bw.shape == (B, T, lstm_hidden)
    print("KERNEL_OK")
</pallas_src>

<mosaic_0001>
module attributes {stable_mosaic.version = 11 : i64} {
  func.func @bilstm_kernel(%arg0: i32, %arg1: memref<64x64xbf16, #tpu.memory_space<vmem>>, %arg2: memref<64x256xbf16, #tpu.memory_space<vmem>>, %arg3: memref<64x256xbf16, #tpu.memory_space<vmem>>, %arg4: memref<1x256xf32, #tpu.memory_space<vmem>>, %arg5: memref<8x1xi32, #tpu.memory_space<vmem>>, %arg6: memref<8x8x64xf32, #tpu.memory_space<vmem>>, %arg7: memref<64x256xf32, #tpu.memory_space<vmem>>) attributes {dimension_semantics = [#tpu.dimension_semantics<arbitrary>], iteration_bounds = array<i64: 1>, scalar_prefetch = 0 : i64, scratch_operands = 1 : i64, tpu.core_type = #tpu.core_type<tc>, window_params = [{pipeline_mode = #tpu.pipeline_mode<synchronous>, transform_indices = @transform_0, window_bounds = array<i64: 64, 64>}, {pipeline_mode = #tpu.pipeline_mode<synchronous>, transform_indices = @transform_1, window_bounds = array<i64: 64, 256>}, {pipeline_mode = #tpu.pipeline_mode<synchronous>, transform_indices = @transform_2, window_bounds = array<i64: 64, 256>}, {pipeline_mode = #tpu.pipeline_mode<synchronous>, transform_indices = @transform_3, window_bounds = array<i64: 1, 256>}, {pipeline_mode = #tpu.pipeline_mode<synchronous>, transform_indices = @transform_4, window_bounds = array<i64: 8, 1>}, {pipeline_mode = #tpu.pipeline_mode<synchronous>, transform_indices = @transform_5, window_bounds = array<i64: 8, 8, 64>}]} {
    %c0 = arith.constant 0 : index
    %c0_0 = arith.constant 0 : index
    %0 = vector.load %arg1[%c0, %c0_0] : memref<64x64xbf16, #tpu.memory_space<vmem>>, vector<64x64xbf16>
    %c0_1 = arith.constant 0 : index
    %c0_2 = arith.constant 0 : index
    %1 = vector.load %arg2[%c0_1, %c0_2] : memref<64x256xbf16, #tpu.memory_space<vmem>>, vector<64x256xbf16>
    %cst = arith.constant dense<0.000000e+00> : vector<64x256xf32>
    %2 = tpu.matmul %0, %1, %cst {dimension_numbers = #tpu.dot_dimension_numbers<[1], [0], [0], [1], [0, 0, 1, 1], [], []>} : vector<64x64xbf16>, vector<64x256xbf16>, vector<64x256xf32> -> vector<64x256xf32>
    %c0_3 = arith.constant 0 : index
    %c0_4 = arith.constant 0 : index
    %3 = vector.load %arg4[%c0_3, %c0_4] : memref<1x256xf32, #tpu.memory_space<vmem>>, vector<1x256xf32>
    %4 = vector.broadcast %3 : vector<1x256xf32> to vector<64x256xf32>
    %5 = arith.addf %2, %4 : vector<64x256xf32>
    %c0_5 = arith.constant 0 : index
    %c0_6 = arith.constant 0 : index
    %6 = vector.load %arg7[%c0_5, %c0_6] : memref<64x256xf32, #tpu.memory_space<vmem>>, vector<64x256xf32>
    tpu.vector_store %arg7[%c0_5, %c0_6], %5 {strides = array<i32>} : memref<64x256xf32, #tpu.memory_space<vmem>>, vector<64x256xf32>,
    %c0_7 = arith.constant 0 : index
    %c0_8 = arith.constant 0 : index
    %7 = vector.load %arg3[%c0_7, %c0_8] : memref<64x256xbf16, #tpu.memory_space<vmem>>, vector<64x256xbf16>
    %8 = tpu.iota {dimensions = array<i32: 1>} : vector<1x256xi32>
    %c128_i32 = arith.constant 128 : i32
    %9 = vector.broadcast %c128_i32 : i32 to vector<1x256xi32>
    %10 = arith.cmpi sge, %8, %9 : vector<1x256xi32>
    %c192_i32 = arith.constant 192 : i32
    %11 = vector.broadcast %c192_i32 : i32 to vector<1x256xi32>
    %12 = arith.cmpi slt, %8, %11 : vector<1x256xi32>
    %13 = arith.andi %10, %12 : vector<1x256xi1>
    %cst_9 = arith.constant 1.000000e+00 : f32
    %cst_10 = arith.constant 5.000000e-01 : f32
    %14 = vector.broadcast %cst_9 : f32 to vector<1x256xf32>
    %15 = vector.broadcast %cst_10 : f32 to vector<1x256xf32>
    %16 = arith.select %13, %14, %15 : vector<1x256xi1>, vector<1x256xf32>
    %cst_11 = arith.constant 0.000000e+00 : f32
    %cst_12 = arith.constant 5.000000e-01 : f32
    %17 = vector.broadcast %cst_11 : f32 to vector<1x256xf32>
    %18 = vector.broadcast %cst_12 : f32 to vector<1x256xf32>
    %19 = arith.select %13, %17, %18 : vector<1x256xi1>, vector<1x256xf32>
    %c0_13 = arith.constant 0 : index
    %c0_14 = arith.constant 0 : index
    %20 = vector.load %arg5[%c0_13, %c0_14] : memref<8x1xi32, #tpu.memory_space<vmem>>, vector<8x1xi32>
    %21 = tpu.iota {dimensions = array<i32: 1>} : vector<8x8xi32>
    %22 = vector.broadcast %20 : vector<8x1xi32> to vector<8x8xi32>
    %23 = arith.cmpi slt, %21, %22 : vector<8x8xi32>
    %24 = arith.extui %23 : vector<8x8xi1> to vector<8x8xi32>
    %25 = arith.sitofp %24 : vector<8x8xi32> to vector<8x8xf32>
    %cst_15 = arith.constant 0.000000e+00 : f32
    %26 = vector.broadcast %cst_15 : f32 to vector<8x64xf32>
    %cst_16 = arith.constant 0.000000e+00 : f32
    %27 = vector.broadcast %cst_16 : f32 to vector<8x64xf32>
    %c0_17 = arith.constant 0 : index
    %c0_18 = arith.constant 0 : index
    %28 = vector.load %arg7[%c0_17, %c0_18] : memref<64x256xf32, #tpu.memory_space<vmem>>, vector<8x256xf32>
    %29 = arith.truncf %26 : vector<8x64xf32> to vector<8x64xbf16>
    %cst_19 = arith.constant dense<0.000000e+00> : vector<8x256xf32>
    %30 = tpu.matmul %29, %7, %cst_19 {dimension_numbers = #tpu.dot_dimension_numbers<[1], [0], [0], [1], [0, 0, 1, 1], [], []>} : vector<8x64xbf16>, vector<64x256xbf16>, vector<8x256xf32> -> vector<8x256xf32>
    %31 = arith.addf %28, %30 : vector<8x256xf32>
    %32 = math.tanh %31 : vector<8x256xf32>
    %33 = vector.broadcast %16 : vector<1x256xf32> to vector<8x256xf32>
    %34 = arith.mulf %33, %32 : vector<8x256xf32>
    %35 = vector.broadcast %19 : vector<1x256xf32> to vector<8x256xf32>
    %36 = arith.addf %34, %35 : vector<8x256xf32>
    %37 = vector.extract_strided_slice %36 {offsets = [0, 0], sizes = [8, 64], strides = [1, 1]} : vector<8x256xf32> to vector<8x64xf32>
    %38 = vector.extract_strided_slice %36 {offsets = [0, 64], sizes = [8, 64], strides = [1, 1]} : vector<8x256xf32> to vector<8x64xf32>
    %39 = vector.extract_strided_slice %36 {offsets = [0, 128], sizes = [8, 64], strides = [1, 1]} : vector<8x256xf32> to vector<8x64xf32>
    %40 = vector.extract_strided_slice %36 {offsets = [0, 192], sizes = [8, 64], strides = [1, 1]} : vector<8x256xf32> to vector<8x64xf32>
    %41 = arith.mulf %38, %27 : vector<8x64xf32>
    %42 = arith.mulf %37, %39 : vector<8x64xf32>
    %43 = arith.addf %41, %42 : vector<8x64xf32>
    %44 = math.tanh %43 : vector<8x64xf32>
    %45 = arith.mulf %40, %44 : vector<8x64xf32>
    %46 = vector.extract_strided_slice %25 {offsets = [0, 0], sizes = [8, 1], strides = [1, 1]} : vector<8x8xf32> to vector<8x1xf32>
    %cst_20 = arith.constant 1.000000e+00 : f32
    %47 = vector.broadcast %cst_20 : f32 to vector<8x1xf32>
    %48 = arith.subf %47, %46 : vector<8x1xf32>
    %49 = vector.broadcast %46 : vector<8x1xf32> to vector<8x64xf32>
    %50 = arith.mulf %49, %45 : vector<8x64xf32>
    %51 = vector.broadcast %46 : vector<8x1xf32> to vector<8x64xf32>
    %52 = arith.mulf %51, %43 : vector<8x64xf32>
    %53 = vector.broadcast %48 : vector<8x1xf32> to vector<8x64xf32>
    %54 = arith.mulf %53, %27 : vector<8x64xf32>
    %55 = arith.addf %52, %54 : vector<8x64xf32>
    %56 = vector.broadcast %48 : vector<8x1xf32> to vector<8x64xf32>
    %57 = arith.mulf %56, %26 : vector<8x64xf32>
    %58 = arith.addf %50, %57 : vector<8x64xf32>
    %c0_21 = arith.constant 0 : index
    %c0_22 = arith.constant 0 : index
    %c0_23 = arith.constant 0 : index
    %59 = vector.load %arg6[%c0_21, %c0_22, %c0_23] : memref<8x8x64xf32, #tpu.memory_space<vmem>>, vector<1x8x64xf32>
    %60 = vector.shape_cast %59 : vector<1x8x64xf32> to vector<8x64xf32>
    %61 = vector.shape_cast %50 : vector<8x64xf32> to vector<1x8x64xf32>
    tpu.vector_store %arg6[%c0_21, %c0_22, %c0_23], %61 {strides = array<i32>} : memref<8x8x64xf32, #tpu.memory_space<vmem>>, vector<1x8x64xf32>,
    %c8 = arith.constant 8 : index
    %c0_24 = arith.constant 0 : index
    %62 = vector.load %arg7[%c8, %c0_24] : memref<64x256xf32, #tpu.memory_space<vmem>>, vector<8x256xf32>
    %63 = arith.truncf %58 : vector<8x64xf32> to vector<8x64xbf16>
    %cst_25 = arith.constant dense<0.000000e+00> : vector<8x256xf32>
    %64 = tpu.matmul %63, %7, %cst_25 {dimension_numbers = #tpu.dot_dimension_numbers<[1], [0], [0], [1], [0, 0, 1, 1], [], []>} : vector<8x64xbf16>, vector<64x256xbf16>, vector<8x256xf32> -> vector<8x256xf32>
    %65 = arith.addf %62, %64 : vector<8x256xf32>
    %66 = math.tanh %65 : vector<8x256xf32>
    %67 = vector.broadcast %16 : vector<1x256xf32> to vector<8x256xf32>
    %68 = arith.mulf %67, %66 : vector<8x256xf32>
    %69 = vector.broadcast %19 : vector<1x256xf32> to vector<8x256xf32>
    %70 = arith.addf %68, %69 : vector<8x256xf32>
    %71 = vector.extract_strided_slice %70 {offsets = [0, 0], sizes = [8, 64], strides = [1, 1]} : vector<8x256xf32> to vector<8x64xf32>
    %72 = vector.extract_strided_slice %70 {offsets = [0, 64], sizes = [8, 64], strides = [1, 1]} : vector<8x256xf32> to vector<8x64xf32>
    %73 = vector.extract_strided_slice %70 {offsets = [0, 128], sizes = [8, 64], strides = [1, 1]} : vector<8x256xf32> to vector<8x64xf32>
    %74 = vector.extract_strided_slice %70 {offsets = [0, 192], sizes = [8, 64], strides = [1, 1]} : vector<8x256xf32> to vector<8x64xf32>
    %75 = arith.mulf %72, %55 : vector<8x64xf32>
    %76 = arith.mulf %71, %73 : vector<8x64xf32>
    %77 = arith.addf %75, %76 : vector<8x64xf32>
    %78 = math.tanh %77 : vector<8x64xf32>
    %79 = arith.mulf %74, %78 : vector<8x64xf32>
    %80 = vector.extract_strided_slice %25 {offsets = [0, 1], sizes = [8, 1], strides = [1, 1]} : vector<8x8xf32> to vector<8x1xf32>
    %cst_26 = arith.constant 1.000000e+00 : f32
    %81 = vector.broadcast %cst_26 : f32 to vector<8x1xf32>
    %82 = arith.subf %81, %80 : vector<8x1xf32>
    %83 = vector.broadcast %80 : vector<8x1xf32> to vector<8x64xf32>
    %84 = arith.mulf %83, %79 : vector<8x64xf32>
    %85 = vector.broadcast %80 : vector<8x1xf32> to vector<8x64xf32>
    %86 = arith.mulf %85, %77 : vector<8x64xf32>
    %87 = vector.broadcast %82 : vector<8x1xf32> to vector<8x64xf32>
    %88 = arith.mulf %87, %55 : vector<8x64xf32>
    %89 = arith.addf %86, %88 : vector<8x64xf32>
    %90 = vector.broadcast %82 : vector<8x1xf32> to vector<8x64xf32>
    %91 = arith.mulf %90, %58 : vector<8x64xf32>
    %92 = arith.addf %84, %91 : vector<8x64xf32>
    %c1 = arith.constant 1 : index
    %c0_27 = arith.constant 0 : index
    %c0_28 = arith.constant 0 : index
    %93 = vector.load %arg6[%c1, %c0_27, %c0_28] : memref<8x8x64xf32, #tpu.memory_space<vmem>>, vector<1x8x64xf32>
    %94 = vector.shape_cast %93 : vector<1x8x64xf32> to vector<8x64xf32>
    %95 = vector.shape_cast %84 : vector<8x64xf32> to vector<1x8x64xf32>
    tpu.vector_store %arg6[%c1, %c0_27, %c0_28], %95 {strides = array<i32>} : memref<8x8x64xf32, #tpu.memory_space<vmem>>, vector<1x8x64xf32>,
    %c16 = arith.constant 16 : index
    %c0_29 = arith.constant 0 : index
    %96 = vector.load %arg7[%c16, %c0_29] : memref<64x256xf32, #tpu.memory_space<vmem>>, vector<8x256xf32>
    %97 = arith.truncf %92 : vector<8x64xf32> to vector<8x64xbf16>
    %cst_30 = arith.constant dense<0.000000e+00> : vector<8x256xf32>
    %98 = tpu.matmul %97, %7, %cst_30 {dimension_numbers = #tpu.dot_dimension_numbers<[1], [0], [0], [1], [0, 0, 1, 1], [], []>} : vector<8x64xbf16>, vector<64x256xbf16>, vector<8x256xf32> -> vector<8x256xf32>
    %99 = arith.addf %96, %98 : vector<8x256xf32>
    %100 = math.tanh %99 : vector<8x256xf32>
    %101 = vector.broadcast %16 : vector<1x256xf32> to vector<8x256xf32>
    %102 = arith.mulf %101, %100 : vector<8x256xf32>
    %103 = vector.broadcast %19 : vector<1x256xf32> to vector<8x256xf32>
    %104 = arith.addf %102, %103 : vector<8x256xf32>
    %105 = vector.extract_strided_slice %104 {offsets = [0, 0], sizes = [8, 64], strides = [1, 1]} : vector<8x256xf32> to vector<8x64xf32>
    %106 = vector.extract_strided_slice %104 {offsets = [0, 64], sizes = [8, 64], strides = [1, 1]} : vector<8x256xf32> to vector<8x64xf32>
    %107 = vector.extract_strided_slice %104 {offsets = [0, 128], sizes = [8, 64], strides = [1, 1]} : vector<8x256xf32> to vector<8x64xf32>
    %108 = vector.extract_strided_slice %104 {offsets = [0, 192], sizes = [8, 64], strides = [1, 1]} : vector<8x256xf32> to vector<8x64xf32>
    %109 = arith.mulf %106, %89 : vector<8x64xf32>
    %110 = arith.mulf %105, %107 : vector<8x64xf32>
    %111 = arith.addf %109, %110 : vector<8x64xf32>
    %112 = math.tanh %111 : vector<8x64xf32>
    %113 = arith.mulf %108, %112 : vector<8x64xf32>
    %114 = vector.extract_strided_slice %25 {offsets = [0, 2], sizes = [8, 1], strides = [1, 1]} : vector<8x8xf32> to vector<8x1xf32>
    %cst_31 = arith.constant 1.000000e+00 : f32
    %115 = vector.broadcast %cst_31 : f32 to vector<8x1xf32>
    %116 = arith.subf %115, %114 : vector<8x1xf32>
    %117 = vector.broadcast %114 : vector<8x1xf32> to vector<8x64xf32>
    %118 = arith.mulf %117, %113 : vector<8x64xf32>
    %119 = vector.broadcast %114 : vector<8x1xf32> to vector<8x64xf32>
    %120 = arith.mulf %119, %111 : vector<8x64xf32>
    %121 = vector.broadcast %116 : vector<8x1xf32> to vector<8x64xf32>
    %122 = arith.mulf %121, %89 : vector<8x64xf32>
    %123 = arith.addf %120, %122 : vector<8x64xf32>
    %124 = vector.broadcast %116 : vector<8x1xf32> to vector<8x64xf32>
    %125 = arith.mulf %124, %92 : vector<8x64xf32>
    %126 = arith.addf %118, %125 : vector<8x64xf32>
    %c2 = arith.constant 2 : index
    %c0_32 = arith.constant 0 : index
    %c0_33 = arith.constant 0 : index
    %127 = vector.load %arg6[%c2, %c0_32, %c0_33] : memref<8x8x64xf32, #tpu.memory_space<vmem>>, vector<1x8x64xf32>
    %128 = vector.shape_cast %127 : vector<1x8x64xf32> to vector<8x64xf32>
    %129 = vector.shape_cast %118 : vector<8x64xf32> to vector<1x8x64xf32>
    tpu.vector_store %arg6[%c2, %c0_32, %c0_33], %129 {strides = array<i32>} : memref<8x8x64xf32, #tpu.memory_space<vmem>>, vector<1x8x64xf32>,
    %c24 = arith.constant 24 : index
    %c0_34 = arith.constant 0 : index
    %130 = vector.load %arg7[%c24, %c0_34] : memref<64x256xf32, #tpu.memory_space<vmem>>, vector<8x256xf32>
    %131 = arith.truncf %126 : vector<8x64xf32> to vector<8x64xbf16>
    %cst_35 = arith.constant dense<0.000000e+00> : vector<8x256xf32>
    %132 = tpu.matmul %131, %7, %cst_35 {dimension_numbers = #tpu.dot_dimension_numbers<[1], [0], [0], [1], [0, 0, 1, 1], [], []>} : vector<8x64xbf16>, vector<64x256xbf16>, vector<8x256xf32> -> vector<8x256xf32>
    %133 = arith.addf %130, %132 : vector<8x256xf32>
    %134 = math.tanh %133 : vector<8x256xf32>
    %135 = vector.broadcast %16 : vector<1x256xf32> to vector<8x256xf32>
    %136 = arith.mulf %135, %134 : vector<8x256xf32>
    %137 = vector.broadcast %19 : vector<1x256xf32> to vector<8x256xf32>
    %138 = arith.addf %136, %137 : vector<8x256xf32>
    %139 = vector.extract_strided_slice %138 {offsets = [0, 0], sizes = [8, 64], strides = [1, 1]} : vector<8x256xf32> to vector<8x64xf32>
    %140 = vector.extract_strided_slice %138 {offsets = [0, 64], sizes = [8, 64], strides = [1, 1]} : vector<8x256xf32> to vector<8x64xf32>
    %141 = vector.extract_strided_slice %138 {offsets = [0, 128], sizes = [8, 64], strides = [1, 1]} : vector<8x256xf32> to vector<8x64xf32>
    %142 = vector.extract_strided_slice %138 {offsets = [0, 192], sizes = [8, 64], strides = [1, 1]} : vector<8x256xf32> to vector<8x64xf32>
    %143 = arith.mulf %140, %123 : vector<8x64xf32>
    %144 = arith.mulf %139, %141 : vector<8x64xf32>
    %145 = arith.addf %143, %144 : vector<8x64xf32>
    %146 = math.tanh %145 : vector<8x64xf32>
    %147 = arith.mulf %142, %146 : vector<8x64xf32>
    %148 = vector.extract_strided_slice %25 {offsets = [0, 3], sizes = [8, 1], strides = [1, 1]} : vector<8x8xf32> to vector<8x1xf32>
    %cst_36 = arith.constant 1.000000e+00 : f32
    %149 = vector.broadcast %cst_36 : f32 to vector<8x1xf32>
    %150 = arith.subf %149, %148 : vector<8x1xf32>
    %151 = vector.broadcast %148 : vector<8x1xf32> to vector<8x64xf32>
    %152 = arith.mulf %151, %147 : vector<8x64xf32>
    %153 = vector.broadcast %148 : vector<8x1xf32> to vector<8x64xf32>
    %154 = arith.mulf %153, %145 : vector<8x64xf32>
    %155 = vector.broadcast %150 : vector<8x1xf32> to vector<8x64xf32>
    %156 = arith.mulf %155, %123 : vector<8x64xf32>
    %157 = arith.addf %154, %156 : vector<8x64xf32>
    %158 = vector.broadcast %150 : vector<8x1xf32> to vector<8x64xf32>
    %159 = arith.mulf %158, %126 : vector<8x64xf32>
    %160 = arith.addf %152, %159 : vector<8x64xf32>
    %c3 = arith.constant 3 : index
    %c0_37 = arith.constant 0 : index
    %c0_38 = arith.constant 0 : index
    %161 = vector.load %arg6[%c3, %c0_37, %c0_38] : memref<8x8x64xf32, #tpu.memory_space<vmem>>, vector<1x8x64xf32>
    %162 = vector.shape_cast %161 : vector<1x8x64xf32> to vector<8x64xf32>
    %163 = vector.shape_cast %152 : vector<8x64xf32> to vector<1x8x64xf32>
    tpu.vector_store %arg6[%c3, %c0_37, %c0_38], %163 {strides = array<i32>} : memref<8x8x64xf32, #tpu.memory_space<vmem>>, vector<1x8x64xf32>,
    %c32 = arith.constant 32 : index
    %c0_39 = arith.constant 0 : index
    %164 = vector.load %arg7[%c32, %c0_39] : memref<64x256xf32, #tpu.memory_space<vmem>>, vector<8x256xf32>
    %165 = arith.truncf %160 : vector<8x64xf32> to vector<8x64xbf16>
    %cst_40 = arith.constant dense<0.000000e+00> : vector<8x256xf32>
    %166 = tpu.matmul %165, %7, %cst_40 {dimension_numbers = #tpu.dot_dimension_numbers<[1], [0], [0], [1], [0, 0, 1, 1], [], []>} : vector<8x64xbf16>, vector<64x256xbf16>, vector<8x256xf32> -> vector<8x256xf32>
    %167 = arith.addf %164, %166 : vector<8x256xf32>
    %168 = math.tanh %167 : vector<8x256xf32>
    %169 = vector.broadcast %16 : vector<1x256xf32> to vector<8x256xf32>
    %170 = arith.mulf %169, %168 : vector<8x256xf32>
    %171 = vector.broadcast %19 : vector<1x256xf32> to vector<8x256xf32>
    %172 = arith.addf %170, %171 : vector<8x256xf32>
    %173 = vector.extract_strided_slice %172 {offsets = [0, 0], sizes = [8, 64], strides = [1, 1]} : vector<8x256xf32> to vector<8x64xf32>
    %174 = vector.extract_strided_slice %172 {offsets = [0, 64], sizes = [8, 64], strides = [1, 1]} : vector<8x256xf32> to vector<8x64xf32>
    %175 = vector.extract_strided_slice %172 {offsets = [0, 128], sizes = [8, 64], strides = [1, 1]} : vector<8x256xf32> to vector<8x64xf32>
    %176 = vector.extract_strided_slice %172 {offsets = [0, 192], sizes = [8, 64], strides = [1, 1]} : vector<8x256xf32> to vector<8x64xf32>
    %177 = arith.mulf %174, %157 : vector<8x64xf32>
    %178 = arith.mulf %173, %175 : vector<8x64xf32>
    %179 = arith.addf %177, %178 : vector<8x64xf32>
    %180 = math.tanh %179 : vector<8x64xf32>
    %181 = arith.mulf %176, %180 : vector<8x64xf32>
    %182 = vector.extract_strided_slice %25 {offsets = [0, 4], sizes = [8, 1], strides = [1, 1]} : vector<8x8xf32> to vector<8x1xf32>
    %cst_41 = arith.constant 1.000000e+00 : f32
    %183 = vector.broadcast %cst_41 : f32 to vector<8x1xf32>
    %184 = arith.subf %183, %182 : vector<8x1xf32>
    %185 = vector.broadcast %182 : vector<8x1xf32> to vector<8x64xf32>
    %186 = arith.mulf %185, %181 : vector<8x64xf32>
    %187 = vector.broadcast %182 : vector<8x1xf32> to vector<8x64xf32>
    %188 = arith.mulf %187, %179 : vector<8x64xf32>
    %189 = vector.broadcast %184 : vector<8x1xf32> to vector<8x64xf32>
    %190 = arith.mulf %189, %157 : vector<8x64xf32>
    %191 = arith.addf %188, %190 : vector<8x64xf32>
    %192 = vector.broadcast %184 : vector<8x1xf32> to vector<8x64xf32>
    %193 = arith.mulf %192, %160 : vector<8x64xf32>
    %194 = arith.addf %186, %193 : vector<8x64xf32>
    %c4 = arith.constant 4 : index
    %c0_42 = arith.constant 0 : index
    %c0_43 = arith.constant 0 : index
    %195 = vector.load %arg6[%c4, %c0_42, %c0_43] : memref<8x8x64xf32, #tpu.memory_space<vmem>>, vector<1x8x64xf32>
    %196 = vector.shape_cast %195 : vector<1x8x64xf32> to vector<8x64xf32>
    %197 = vector.shape_cast %186 : vector<8x64xf32> to vector<1x8x64xf32>
    tpu.vector_store %arg6[%c4, %c0_42, %c0_43], %197 {strides = array<i32>} : memref<8x8x64xf32, #tpu.memory_space<vmem>>, vector<1x8x64xf32>,
    %c40 = arith.constant 40 : index
    %c0_44 = arith.constant 0 : index
    %198 = vector.load %arg7[%c40, %c0_44] : memref<64x256xf32, #tpu.memory_space<vmem>>, vector<8x256xf32>
    %199 = arith.truncf %194 : vector<8x64xf32> to vector<8x64xbf16>
    %cst_45 = arith.constant dense<0.000000e+00> : vector<8x256xf32>
    %200 = tpu.matmul %199, %7, %cst_45 {dimension_numbers = #tpu.dot_dimension_numbers<[1], [0], [0], [1], [0, 0, 1, 1], [], []>} : vector<8x64xbf16>, vector<64x256xbf16>, vector<8x256xf32> -> vector<8x256xf32>
    %201 = arith.addf %198, %200 : vector<8x256xf32>
    %202 = math.tanh %201 : vector<8x256xf32>
    %203 = vector.broadcast %16 : vector<1x256xf32> to vector<8x256xf32>
    %204 = arith.mulf %203, %202 : vector<8x256xf32>
    %205 = vector.broadcast %19 : vector<1x256xf32> to vector<8x256xf32>
    %206 = arith.addf %204, %205 : vector<8x256xf32>
    %207 = vector.extract_strided_slice %206 {offsets = [0, 0], sizes = [8, 64], strides = [1, 1]} : vector<8x256xf32> to vector<8x64xf32>
    %208 = vector.extract_strided_slice %206 {offsets = [0, 64], sizes = [8, 64], strides = [1, 1]} : vector<8x256xf32> to vector<8x64xf32>
    %209 = vector.extract_strided_slice %206 {offsets = [0, 128], sizes = [8, 64], strides = [1, 1]} : vector<8x256xf32> to vector<8x64xf32>
    %210 = vector.extract_strided_slice %206 {offsets = [0, 192], sizes = [8, 64], strides = [1, 1]} : vector<8x256xf32> to vector<8x64xf32>
    %211 = arith.mulf %208, %191 : vector<8x64xf32>
    %212 = arith.mulf %207, %209 : vector<8x64xf32>
    %213 = arith.addf %211, %212 : vector<8x64xf32>
    %214 = math.tanh %213 : vector<8x64xf32>
    %215 = arith.mulf %210, %214 : vector<8x64xf32>
    %216 = vector.extract_strided_slice %25 {offsets = [0, 5], sizes = [8, 1], strides = [1, 1]} : vector<8x8xf32> to vector<8x1xf32>
    %cst_46 = arith.constant 1.000000e+00 : f32
    %217 = vector.broadcast %cst_46 : f32 to vector<8x1xf32>
    %218 = arith.subf %217, %216 : vector<8x1xf32>
    %219 = vector.broadcast %216 : vector<8x1xf32> to vector<8x64xf32>
    %220 = arith.mulf %219, %215 : vector<8x64xf32>
    %221 = vector.broadcast %216 : vector<8x1xf32> to vector<8x64xf32>
    %222 = arith.mulf %221, %213 : vector<8x64xf32>
    %223 = vector.broadcast %218 : vector<8x1xf32> to vector<8x64xf32>
    %224 = arith.mulf %223, %191 : vector<8x64xf32>
    %225 = arith.addf %222, %224 : vector<8x64xf32>
    %226 = vector.broadcast %218 : vector<8x1xf32> to vector<8x64xf32>
    %227 = arith.mulf %226, %194 : vector<8x64xf32>
    %228 = arith.addf %220, %227 : vector<8x64xf32>
    %c5 = arith.constant 5 : index
    %c0_47 = arith.constant 0 : index
    %c0_48 = arith.constant 0 : index
    %229 = vector.load %arg6[%c5, %c0_47, %c0_48] : memref<8x8x64xf32, #tpu.memory_space<vmem>>, vector<1x8x64xf32>
    %230 = vector.shape_cast %229 : vector<1x8x64xf32> to vector<8x64xf32>
    %231 = vector.shape_cast %220 : vector<8x64xf32> to vector<1x8x64xf32>
    tpu.vector_store %arg6[%c5, %c0_47, %c0_48], %231 {strides = array<i32>} : memref<8x8x64xf32, #tpu.memory_space<vmem>>, vector<1x8x64xf32>,
    %c48 = arith.constant 48 : index
    %c0_49 = arith.constant 0 : index
    %232 = vector.load %arg7[%c48, %c0_49] : memref<64x256xf32, #tpu.memory_space<vmem>>, vector<8x256xf32>
    %233 = arith.truncf %228 : vector<8x64xf32> to vector<8x64xbf16>
    %cst_50 = arith.constant dense<0.000000e+00> : vector<8x256xf32>
    %234 = tpu.matmul %233, %7, %cst_50 {dimension_numbers = #tpu.dot_dimension_numbers<[1], [0], [0], [1], [0, 0, 1, 1], [], []>} : vector<8x64xbf16>, vector<64x256xbf16>, vector<8x256xf32> -> vector<8x256xf32>
    %235 = arith.addf %232, %234 : vector<8x256xf32>
    %236 = math.tanh %235 : vector<8x256xf32>
    %237 = vector.broadcast %16 : vector<1x256xf32> to vector<8x256xf32>
    %238 = arith.mulf %237, %236 : vector<8x256xf32>
    %239 = vector.broadcast %19 : vector<1x256xf32> to vector<8x256xf32>
    %240 = arith.addf %238, %239 : vector<8x256xf32>
    %241 = vector.extract_strided_slice %240 {offsets = [0, 0], sizes = [8, 64], strides = [1, 1]} : vector<8x256xf32> to vector<8x64xf32>
    %242 = vector.extract_strided_slice %240 {offsets = [0, 64], sizes = [8, 64], strides = [1, 1]} : vector<8x256xf32> to vector<8x64xf32>
    %243 = vector.extract_strided_slice %240 {offsets = [0, 128], sizes = [8, 64], strides = [1, 1]} : vector<8x256xf32> to vector<8x64xf32>
    %244 = vector.extract_strided_slice %240 {offsets = [0, 192], sizes = [8, 64], strides = [1, 1]} : vector<8x256xf32> to vector<8x64xf32>
    %245 = arith.mulf %242, %225 : vector<8x64xf32>
    %246 = arith.mulf %241, %243 : vector<8x64xf32>
    %247 = arith.addf %245, %246 : vector<8x64xf32>
    %248 = math.tanh %247 : vector<8x64xf32>
    %249 = arith.mulf %244, %248 : vector<8x64xf32>
    %250 = vector.extract_strided_slice %25 {offsets = [0, 6], sizes = [8, 1], strides = [1, 1]} : vector<8x8xf32> to vector<8x1xf32>
    %cst_51 = arith.constant 1.000000e+00 : f32
    %251 = vector.broadcast %cst_51 : f32 to vector<8x1xf32>
    %252 = arith.subf %251, %250 : vector<8x1xf32>
    %253 = vector.broadcast %250 : vector<8x1xf32> to vector<8x64xf32>
    %254 = arith.mulf %253, %249 : vector<8x64xf32>
    %255 = vector.broadcast %250 : vector<8x1xf32> to vector<8x64xf32>
    %256 = arith.mulf %255, %247 : vector<8x64xf32>
    %257 = vector.broadcast %252 : vector<8x1xf32> to vector<8x64xf32>
    %258 = arith.mulf %257, %225 : vector<8x64xf32>
    %259 = arith.addf %256, %258 : vector<8x64xf32>
    %260 = vector.broadcast %252 : vector<8x1xf32> to vector<8x64xf32>
    %261 = arith.mulf %260, %228 : vector<8x64xf32>
    %262 = arith.addf %254, %261 : vector<8x64xf32>
    %c6 = arith.constant 6 : index
    %c0_52 = arith.constant 0 : index
    %c0_53 = arith.constant 0 : index
    %263 = vector.load %arg6[%c6, %c0_52, %c0_53] : memref<8x8x64xf32, #tpu.memory_space<vmem>>, vector<1x8x64xf32>
    %264 = vector.shape_cast %263 : vector<1x8x64xf32> to vector<8x64xf32>
    %265 = vector.shape_cast %254 : vector<8x64xf32> to vector<1x8x64xf32>
    tpu.vector_store %arg6[%c6, %c0_52, %c0_53], %265 {strides = array<i32>} : memref<8x8x64xf32, #tpu.memory_space<vmem>>, vector<1x8x64xf32>,
    %c56 = arith.constant 56 : index
    %c0_54 = arith.constant 0 : index
    %266 = vector.load %arg7[%c56, %c0_54] : memref<64x256xf32, #tpu.memory_space<vmem>>, vector<8x256xf32>
    %267 = arith.truncf %262 : vector<8x64xf32> to vector<8x64xbf16>
    %cst_55 = arith.constant dense<0.000000e+00> : vector<8x256xf32>
    %268 = tpu.matmul %267, %7, %cst_55 {dimension_numbers = #tpu.dot_dimension_numbers<[1], [0], [0], [1], [0, 0, 1, 1], [], []>} : vector<8x64xbf16>, vector<64x256xbf16>, vector<8x256xf32> -> vector<8x256xf32>
    %269 = arith.addf %266, %268 : vector<8x256xf32>
    %270 = math.tanh %269 : vector<8x256xf32>
    %271 = vector.broadcast %16 : vector<1x256xf32> to vector<8x256xf32>
    %272 = arith.mulf %271, %270 : vector<8x256xf32>
    %273 = vector.broadcast %19 : vector<1x256xf32> to vector<8x256xf32>
    %274 = arith.addf %272, %273 : vector<8x256xf32>
    %275 = vector.extract_strided_slice %274 {offsets = [0, 0], sizes = [8, 64], strides = [1, 1]} : vector<8x256xf32> to vector<8x64xf32>
    %276 = vector.extract_strided_slice %274 {offsets = [0, 64], sizes = [8, 64], strides = [1, 1]} : vector<8x256xf32> to vector<8x64xf32>
    %277 = vector.extract_strided_slice %274 {offsets = [0, 128], sizes = [8, 64], strides = [1, 1]} : vector<8x256xf32> to vector<8x64xf32>
    %278 = vector.extract_strided_slice %274 {offsets = [0, 192], sizes = [8, 64], strides = [1, 1]} : vector<8x256xf32> to vector<8x64xf32>
    %279 = arith.mulf %276, %259 : vector<8x64xf32>
    %280 = arith.mulf %275, %277 : vector<8x64xf32>
    %281 = arith.addf %279, %280 : vector<8x64xf32>
    %282 = math.tanh %281 : vector<8x64xf32>
    %283 = arith.mulf %278, %282 : vector<8x64xf32>
    %284 = vector.extract_strided_slice %25 {offsets = [0, 7], sizes = [8, 1], strides = [1, 1]} : vector<8x8xf32> to vector<8x1xf32>
    %285 = vector.broadcast %284 : vector<8x1xf32> to vector<8x64xf32>
    %286 = arith.mulf %285, %283 : vector<8x64xf32>
    %c7 = arith.constant 7 : index
    %c0_56 = arith.constant 0 : index
    %c0_57 = arith.constant 0 : index
    %287 = vector.load %arg6[%c7, %c0_56, %c0_57] : memref<8x8x64xf32, #tpu.memory_space<vmem>>, vector<1x8x64xf32>
    %288 = vector.shape_cast %287 : vector<1x8x64xf32> to vector<8x64xf32>
    %289 = vector.shape_cast %286 : vector<8x64xf32> to vector<1x8x64xf32>
    tpu.vector_store %arg6[%c7, %c0_56, %c0_57], %289 {strides = array<i32>} : memref<8x8x64xf32, #tpu.memory_space<vmem>>, vector<1x8x64xf32>,
    return
  }
  func.func @transform_0(%arg0: i32) -> (i32, i32) {
    %c0_i32 = arith.constant 0 : i32
    %c0_i32_0 = arith.constant 0 : i32
    %c0_i32_1 = arith.constant 0 : i32
    return %c0_i32, %c0_i32_0 : i32, i32
  }
  func.func @transform_1(%arg0: i32) -> (i32, i32) {
    %c0_i32 = arith.constant 0 : i32
    %c0_i32_0 = arith.constant 0 : i32
    %c0_i32_1 = arith.constant 0 : i32
    return %c0_i32, %c0_i32_0 : i32, i32
  }
  func.func @transform_2(%arg0: i32) -> (i32, i32) {
    %c0_i32 = arith.constant 0 : i32
    %c0_i32_0 = arith.constant 0 : i32
    %c0_i32_1 = arith.constant 0 : i32
    return %c0_i32, %c0_i32_0 : i32, i32
  }
  func.func @transform_3(%arg0: i32) -> (i32, i32) {
    %c0_i32 = arith.constant 0 : i32
    %c0_i32_0 = arith.constant 0 : i32
    %c0_i32_1 = arith.constant 0 : i32
    return %c0_i32, %c0_i32_0 : i32, i32
  }
  func.func @transform_4(%arg0: i32) -> (i32, i32) {
    %c0_i32 = arith.constant 0 : i32
    %c0_i32_0 = arith.constant 0 : i32
    %c0_i32_1 = arith.constant 0 : i32
    return %c0_i32, %c0_i32_0 : i32, i32
  }
  func.func @transform_5(%arg0: i32) -> (i32, i32, i32) {
    %c0_i32 = arith.constant 0 : i32
    %c0_i32_0 = arith.constant 0 : i32
    %c0_i32_1 = arith.constant 0 : i32
    %c0_i32_2 = arith.constant 0 : i32
    return %c0_i32, %c0_i32_0, %c0_i32_1 : i32, i32, i32
  }
}

</mosaic_0001>

<bundles_post_ra>
// kernel: word_sequence1_forward.1
= control target key start
LH: loop header
LB: loop body
LE: loop exit
PB: predicated region body
PF: predicated region fallthrough
CT: control target
= control target key end

     0   :  { %v1108_v1 = vmov 0   ;;  %vm109_vm0 = vcmask 523264   ;;  %v39_v19 = vlaneseq  ;;  %v1109_v22 = vmov 0.0   ;;  %s1507_s1 = inlined_call_operand.vmem [shape: bf16[64,256], index: 1, kind: input, shape index: {}]   ;;  %s1508_s2 = inlined_call_operand.vmem [shape: bf16[64,256], index: 2, kind: input, shape index: {}]   ;;  %s1509_s4 = inlined_call_operand.vmem [shape: s32[8,1], index: 4, kind: input, shape index: {}]   ;;  %s1510_s0 = inlined_call_operand.vmem [shape: bf16[64,64], index: 0, kind: input, shape index: {}]   ;;  %s1511_s3 = inlined_call_operand.vmem [shape: f32[1,256], index: 3, kind: input, shape index: {}]   ;;  %s1512_s5 = inlined_call_operand.vmem [shape: f32[8,8,64], index: 5, kind: output, shape index: {}]  }
   0x1   :  { %v1032_v0 = vld [vmem:[%s1507_s1 + $0x4] ss:$8 sps:$4 sm:$0xff]   ;;  %154 = vmatprep.mubr.bf16.mxu0 %v1108_v1  ;;  %316 = vmatprep.mubr.bf16.mxu1 %v1108_v1  ;;  %v1036_v3 = vld [vmem:[%s1507_s1] ss:$8 sps:$4 sm:$0xff]   ;;  %v1038_v5 = vld [vmem:[%s1507_s1 + $0x14] ss:$8 sps:$4 sm:$0xff]  }
   0x2   :  { %v1157_v2 = vld [vmem:[%s1508_s2 + $0x4] ss:$8 sps:$4 sm:$0xff]   ;;  %1017 = vset.pattern.permute.xlu0 %v1108_v1  ;;  %1018 = vset.pattern.permute.xlu1 %v1108_v1  ;;  %v1167_v4 = vld [vmem:[%s1508_s2] ss:$8 sps:$4 sm:$0xff]   ;;  %v1177_v6 = vld [vmem:[%s1508_s2 + $0x14] ss:$8 sps:$4 sm:$0xff]  }
   0x3   :  { %122 = vmatprep.subr.bf16.mxu0 %v1032_v0  ;;  %284 = vmatprep.subr.bf16.mxu1 %v1157_v2  ;;  %v1042_v7 = vld [vmem:[%s1507_s1 + $0x10] ss:$8 sps:$4 sm:$0xff]   ;;  %v1044_v9 = vld [vmem:[%s1507_s1 + $0x24] ss:$8 sps:$4 sm:$0xff]   ;;  %v1048_v11 = vld [vmem:[%s1507_s1 + $0x20] ss:$8 sps:$4 sm:$0xff]  }
   0x4   :  { %123 = vmatpush1.bf16.msra.mxu0 %v1036_v3  ;;  %285 = vmatpush1.bf16.msra.mxu1 %v1167_v4  ;;  %v1185_v8 = vld [vmem:[%s1508_s2 + $0x10] ss:$8 sps:$4 sm:$0xff]   ;;  %v1194_v10 = vld [vmem:[%s1508_s2 + $0x24] ss:$8 sps:$4 sm:$0xff]   ;;  %v1202_v12 = vld [vmem:[%s1508_s2 + $0x20] ss:$8 sps:$4 sm:$0xff]  }
   0x5   :  { %124 = vmatprep.subr.bf16.mxu0 %v1038_v5  ;;  %286 = vmatprep.subr.bf16.mxu1 %v1177_v6  ;;  %v1050_v13 = vld [vmem:[%s1507_s1 + $0x34] ss:$8 sps:$4 sm:$0xff]   ;;  %v1054_v15 = vld [vmem:[%s1507_s1 + $0x30] ss:$8 sps:$4 sm:$0xff]   ;;  %v232_v16 = vld [vmem:[%s1509_s4] sm:$0xff]  ;;  %v220_v20 = vand.u32 127, %v39_v19 }
   0x6   :  { %v1212_v14 = vld [vmem:[%s1508_s2 + $0x34] ss:$8 sps:$4 sm:$0xff]   ;;  %v1224_v17 = vld [vmem:[%s1508_s2 + $0x30] ss:$8 sps:$4 sm:$0xff]   ;;  %234 = vperm.xlu0 %1017, %v232_v16   ;;  %v1056_v18 = vld [vmem:[%s1510_s0] sm:$0xff]   ;;  %v40_v25 = vshrl.u32 %v39_v19, 7 }
   0x7   :  { %v37_v27 = vld [vmem:[%s1511_s3] sm:$0x3]  ;;  %v221_v43 = vadd.s32 128, %v220_v20  ;;  %v1110_v44 = vmov 0.5   ;;  %s1111_s3 = smov 64   ;;  %v1112_v54 = vmov 1  }
   0x8   :  { %125 = vmatpush1.bf16.msra.mxu0 %v1042_v7  ;;  %287 = vmatpush1.bf16.msra.mxu1 %v1185_v8  ;;  %v41_v26 = vsub.s32 0, %v40_v25  ;;  %v45_v28 = vsub.s32 1, %v40_v25 }
   0x9   :  { %126 = vmatprep.subr.bf16.mxu0 %v1044_v9  ;;  %288 = vmatprep.subr.bf16.mxu1 %v1194_v10  ;;  %vm225_vm2 = vcmp.lt.s32.totalorder %v221_v43, 192 }
   0xa   :  { %v1263_v29 = vrot.slane %v37_v27, %v41_v26  ;;  %v1265_v30 = vrot.slane %v37_v27, %v45_v28  ;;  %v1269_v45 = vsel %vm225_vm2, 1.0, %v1110_v44  ;;  %v1271_v49 = vsel %vm225_vm2, 0.0, %v1110_v44  ;;  %1019 = vset.pattern.permute.xlu0 %v1112_v54 }
   0xc   :  { %127 = vmatpush1.bf16.msra.mxu0 %v1048_v11  ;;  %289 = vmatpush1.bf16.msra.mxu1 %v1202_v12 }
   0xd   :  { %128 = vmatprep.subr.bf16.mxu0 %v1050_v13  ;;  %290 = vmatprep.subr.bf16.mxu1 %v1212_v14 }
  0x10   :  { %129 = vmatpush1.bf16.msra.mxu0 %v1054_v15  ;;  %291 = vmatpush1.bf16.msra.mxu1 %v1224_v17 }
  0x11   :  { %372 = vmatprep.subr.bf16.mxu1 %v1157_v2  ;;  %459 = vmatprep.subr.bf16.mxu0 %v1157_v2 }
  0x13   :  { %979 = vmatmul.mubr.msk.bf16.vlgmr.msra.gmra.mrb[0].mxu0 %vm109_vm0, %v1056_v18  ;;  %317 = vmatmul.mubr.bf16.vlgmr.msra.gmra.mrb[0].mxu1 %v1108_v1 }
  0x14   :  { %373 = vmatpush1.bf16.msra.mxu1 %v1167_v4  ;;  %404 = vmatprep.mubr.bf16.mxu1 %v1108_v1 }
  0x15   :  { %374 = vmatprep.subr.bf16.mxu1 %v1177_v6  ;;  %460 = vmatpush1.bf16.msra.mxu0 %v1167_v4 }
  0x16   :  { %164 = vmatprep.mubr.bf16.mxu0 %v1108_v1  ;;  %461 = vmatprep.subr.bf16.mxu0 %v1177_v6 }
  0x18   :  { %375 = vmatpush1.bf16.msra.mxu1 %v1185_v8 }
  0x19   :  { %376 = vmatprep.subr.bf16.mxu1 %v1194_v10  ;;  %462 = vmatpush1.bf16.msra.mxu0 %v1185_v8 }
  0x1a   :  { %463 = vmatprep.subr.bf16.mxu0 %v1194_v10 }
  0x1c   :  { %377 = vmatpush1.bf16.msra.mxu1 %v1202_v12 }
  0x1d   :  { %378 = vmatprep.subr.bf16.mxu1 %v1212_v14  ;;  %464 = vmatpush1.bf16.msra.mxu0 %v1202_v12 }
  0x1e   :  { %465 = vmatprep.subr.bf16.mxu0 %v1212_v14 }
  0x20   :  { %379 = vmatpush1.bf16.msra.mxu1 %v1224_v17 }
  0x21   :  { %466 = vmatpush1.bf16.msra.mxu0 %v1224_v17  ;;  %546 = vmatprep.subr.bf16.mxu1 %v1157_v2 }
  0x22   :  { %633 = vmatprep.subr.bf16.mxu0 %v1157_v2 }
  0x85   :  { %v235_v21 = vpop.permute.xlu0 %234 }
  0x86   :  { %vm236_vm1 = vcmp.lt.s32.totalorder %v220_v20, %v235_v21 }
  0x87   :  { %v1253_v23 = vsel %vm236_vm1, 1.0, %v1109_v22 }
  0x88   :  { %v1256_v24 = vsub.f32 1.0, %v1253_v23  ;;  %345 = vperm.xlu1 %1018, %v1253_v23  }
  0x8c   :  { %352 = vperm.xlu1 %1018, %v1256_v24  }
  0x90   :  { %1020 = vset.pattern.permute.xlu1 %v1112_v54 }
  0xe6   :  { %v156_v31 = vpop.f32.mrb[0].mxu0  ;;  %v318_v32 = vpop.f32.mrb[0].mxu1 }
  0xe7   :  { %v157_v33 = vadd.f32 %v156_v31, %v1263_v29  ;;  %v158_v34 = vpop.f32.mrb[1].mxu0  ;;  %v320_v35 = vpop.f32.mrb[1].mxu1 }
  0xe8   :  { %v159_v36 = vadd.f32 %v158_v34, %v1265_v30  ;;  %v160_v37 = vpop.f32.mrb[2].mxu0  ;;  %v322_v38 = vpop.f32.mrb[2].mxu1  ;;  %v1057_v34 = vld [vmem:[%s1510_s0 + $0x8] sm:$0xff]  }
  0xe9   :  { %v325_v39 = vadd.f32 %v318_v32, %v157_v33  ;;  %v162_v40 = vpop.f32.mrb[3].mxu0  ;;  %v323_v41 = vpop.f32.mrb[3].mxu1  ;;  %v161_v11 = vadd.f32 %v160_v37, %v1263_v29  ;;  %v1113_v33 = vmov 2   ;;  %980 = vmatmul.mubr.msk.bf16.gmra.mrb[4].mxu0 %vm109_vm0, %v1057_v34 }
  0xea   :  { %v326_v42 = vadd.f32 %v320_v35, %v159_v36  ;;  %v163_v13 = vadd.f32 %v162_v40, %v1265_v30  ;;  %174 = vmatprep.mubr.bf16.mxu0 %v1108_v1  ;;  %v1058_v35 = vld [vmem:[%s1510_s0 + $0x10] sm:$0xff]   ;;  %v1059_v36 = vld [vmem:[%s1510_s0 + $0x18] sm:$0xff]  }
  0xeb   :  { %1060 = vtanh.f32 %v325_v39 }
  0xec   :  { %1062 = vtanh.f32 %v326_v42 }
  0xf1   :  { %981 = vmatmul.mubr.msk.bf16.gmra.mrb[8].mxu0 %vm109_vm0, %v1058_v35 }
  0xf2   :  { %184 = vmatprep.mubr.bf16.mxu0 %v1108_v1 }
  0xf5   :  { %v1061_v46 = vpop.eup %1060 }
  0xf6   :  { %v1063_v47 = vpop.eup %1062  ;;  %v329_v48 = vmul.f32 0.5, %v1061_v46 }
  0xf7   :  { %v330_v50 = vmul.f32 %v1063_v47, %v1269_v45 }
  0xf8   :  { %v331_v51 = vadd.f32 0.5, %v329_v48 }
  0xf9   :  { %v332_v52 = vadd.f32 %v330_v50, %v1271_v49  ;;  %982 = vmatmul.mubr.msk.bf16.gmra.mrb[12].mxu0 %vm109_vm0, %v1059_v36 }
  0xfa   :  { %v333_v57 = vmul.f32 0.0, %v331_v51  ;;  %491 = vmatprep.mubr.bf16.mxu0 %v1108_v1 }
  0xfb   :  { %v334_v53 = vmul.f32 %v332_v52, %v331_v51 }
  0xfd   :  { %336 = vrot.lane.b32.xlu0 %v334_v53, %s1111_s3 }
 0x107   :  { %v346_v55 = vpop.permute.xlu1 %345 }
 0x10b   :  { %v353_v56 = vpop.permute.xlu1 %352 }
 0x10c   :  { %v355_v60 = vmul.f32 0.0, %v353_v56 }
 0x16f   :  { %v337_v58 = vpop.permute.xlu0 %336 }
 0x170   :  { %v339_v59 = vadd.f32 %v337_v58, %v333_v57 }
 0x172   :  { %1064 = vtanh.f32 %v339_v59  ;;  %v349_v61 = vmul.f32 %v346_v55, %v339_v59 }
 0x174   :  { %v1276_v62 = vadd.f32 %v355_v60, %v349_v61 }
 0x17c   :  { %v1065_v63 = vpop.eup %1064 }
 0x17d   :  { %v341_v0 = vmul.f32 %v1065_v63, %v332_v52 }
 0x17f   :  { %v1278_v3 = vmul.f32 %v346_v55, %v341_v0  ;;  %v1114_v0 = vmov 3  }
 0x181   :  { %v357_v5 = vadd.f32 %v355_v60, %v1278_v3 }
 0x183   :  { %v365_v7 = vpack.c.bf16 %v357_v5, %v357_v5 }
 0x185   :  { %367 = vrot.lane.b32.xlu0 %v365_v7, %s1111_s3 }
 0x189   :  { %431 = vperm.xlu0 %1019, %v1253_v23  }
 0x18d   :  { %1022 = vset.pattern.permute.xlu0 %v1113_v33 }
 0x1bc   :  { %v166_v50 = vpop.f32.mrb[4].mxu0 }
 0x1bd   :  { %v168_v51 = vpop.f32.mrb[5].mxu0 }
 0x1be   :  { %v1324_v52 = vpop.f32.mrb[6].mxu0  ;;  %v169_v7 = vadd.f32 %v168_v51, %v1265_v30 }
 0x1bf   :  { %v1326_v53 = vpop.f32.mrb[7].mxu0 }
 0x1c4   :  { %v1328_v54 = vpop.f32.mrb[8].mxu0 }
 0x1c5   :  { %v1330_v55 = vpop.f32.mrb[9].mxu0 }
 0x1c6   :  { %v1332_v56 = vpop.f32.mrb[10].mxu0 }
 0x1c7   :  { %v1334_v57 = vpop.f32.mrb[11].mxu0 }
 0x1cc   :  { %v1336_v58 = vpop.f32.mrb[12].mxu0 }
 0x1cd   :  { %v1338_v59 = vpop.f32.mrb[13].mxu0 }
 0x1ce   :  { %v1340_v60 = vpop.f32.mrb[14].mxu0 }
 0x1cf   :  { %v1342_v61 = vpop.f32.mrb[15].mxu0 }
 0x1f7   :  { %v368_v9 = vpop.permute.xlu0 %367 }
 0x1f8   :  { %992 = vmatmul.mubr.msk.bf16.vlgmr.msra.gmra.mrb[4].mxu1 %vm109_vm0, %v368_v9 }
 0x1f9   :  { %547 = vmatpush1.bf16.msra.mxu1 %v1167_v4  ;;  %578 = vmatprep.mubr.bf16.mxu1 %v1108_v1 }
 0x1fa   :  { %548 = vmatprep.subr.bf16.mxu1 %v1177_v6 }
 0x1fd   :  { %549 = vmatpush1.bf16.msra.mxu1 %v1185_v8 }
 0x1fe   :  { %550 = vmatprep.subr.bf16.mxu1 %v1194_v10 }
 0x201   :  { %551 = vmatpush1.bf16.msra.mxu1 %v1202_v12 }
 0x202   :  { %552 = vmatprep.subr.bf16.mxu1 %v1212_v14 }
 0x205   :  { %553 = vmatpush1.bf16.msra.mxu1 %v1224_v17 }
 0x206   :  { %720 = vmatprep.subr.bf16.mxu1 %v1157_v2 }
 0x208   :  { %v432_v42 = vpop.permute.xlu0 %431 }
 0x2cb   :  { %v406_v15 = vpop.f32.mrb[4].mxu1 }
 0x2cc   :  { %v413_v16 = vadd.f32 %v406_v15, %v161_v11  ;;  %v408_v18 = vpop.f32.mrb[5].mxu1 }
 0x2cd   :  { %v414_v19 = vadd.f32 %v408_v18, %v163_v13  ;;  %v410_v20 = vpop.f32.mrb[6].mxu1 }
 0x2ce   :  { %1066 = vtanh.f32 %v413_v16  ;;  %v411_v21 = vpop.f32.mrb[7].mxu1 }
 0x2cf   :  { %1068 = vtanh.f32 %v414_v19 }
 0x2d8   :  { %v1067_v22 = vpop.eup %1066 }
 0x2d9   :  { %v1069_v25 = vpop.eup %1068  ;;  %v417_v26 = vmul.f32 0.5, %v1067_v22 }
 0x2da   :  { %v418_v27 = vmul.f32 %v1069_v25, %v1269_v45 }
 0x2db   :  { %v419_v28 = vadd.f32 0.5, %v417_v26 }
 0x2dc   :  { %v420_v31 = vadd.f32 %v418_v27, %v1271_v49 }
 0x2dd   :  { %v421_v37 = vmul.f32 %v419_v28, %v1276_v62 }
 0x2de   :  { %v422_v32 = vmul.f32 %v420_v31, %v419_v28 }
 0x2e0   :  { %424 = vrot.lane.b32.xlu1 %v422_v32, %s1111_s3 }
 0x2e4   :  { %437 = vperm.xlu1 %1020, %v1256_v24  }
 0x2e8   :  { %1021 = vset.pattern.permute.xlu1 %v1113_v33 }
 0x352   :  { %v425_v38 = vpop.permute.xlu1 %424 }
 0x353   :  { %v427_v39 = vadd.f32 %v425_v38, %v421_v37 }
 0x355   :  { %1070 = vtanh.f32 %v427_v39 }
 0x35f   :  { %v1071_v40 = vpop.eup %1070 }
 0x360   :  { %v429_v41 = vmul.f32 %v1071_v40, %v420_v31  ;;  %v435_v31 = vmul.f32 %v432_v42, %v427_v39 }
 0x362   :  { %v1315_v44 = vmul.f32 %v432_v42, %v429_v41 }
 0x363   :  { %v438_v43 = vpop.permute.xlu1 %437 }
 0x364   :  { %v442_v46 = vmul.f32 %v438_v43, %v357_v5  ;;  %v167_v5 = vadd.f32 %v166_v50, %v1263_v29  ;;  %v440_v28 = vmul.f32 %v438_v43, %v1276_v62  ;;  %v171_v43 = vadd.f32 %v1324_v52, %v1263_v29 }
 0x366   :  { %v1318_v47 = vadd.f32 %v442_v46, %v1315_v44  ;;  %v441_v32 = vadd.f32 %v440_v28, %v435_v31 }
 0x368   :  { %v452_v48 = vpack.c.bf16 %v1318_v47, %v1318_v47 }
 0x36a   :  { %454 = vrot.lane.b32.xlu1 %v452_v48, %s1111_s3 }
 0x36e   :  { %518 = vperm.xlu1 %1021, %v1253_v23  }
 0x372   :  { %1024 = vset.pattern.permute.xlu1 %v1114_v0 }
 0x3dc   :  { %v455_v63 = vpop.permute.xlu1 %454 }
 0x3dd   :  { %994 = vmatmul.mubr.msk.bf16.vlgmr.msra.gmra.mrb[16].mxu0 %vm109_vm0, %v455_v63 }
 0x3de   :  { %634 = vmatpush1.bf16.msra.mxu0 %v1167_v4  ;;  %665 = vmatprep.mubr.bf16.mxu0 %v1108_v1 }
 0x3df   :  { %635 = vmatprep.subr.bf16.mxu0 %v1177_v6 }
 0x3e2   :  { %636 = vmatpush1.bf16.msra.mxu0 %v1185_v8 }
 0x3e3   :  { %637 = vmatprep.subr.bf16.mxu0 %v1194_v10 }
 0x3e6   :  { %638 = vmatpush1.bf16.msra.mxu0 %v1202_v12 }
 0x3e7   :  { %639 = vmatprep.subr.bf16.mxu0 %v1212_v14 }
 0x3ea   :  { %640 = vmatpush1.bf16.msra.mxu0 %v1224_v17 }
 0x3eb   :  { %807 = vmatprep.subr.bf16.mxu0 %v1157_v2 }
 0x3ed   :  { %v519_v38 = vpop.permute.xlu1 %518 }
 0x4b0   :  { %v493_v9 = vpop.f32.mrb[16].mxu0 }
 0x4b1   :  { %v500_v11 = vadd.f32 %v493_v9, %v167_v5  ;;  %v495_v13 = vpop.f32.mrb[17].mxu0 }
 0x4b2   :  { %v501_v15 = vadd.f32 %v495_v13, %v169_v7  ;;  %v497_v16 = vpop.f32.mrb[18].mxu0 }
 0x4b3   :  { %1072 = vtanh.f32 %v500_v11  ;;  %v498_v18 = vpop.f32.mrb[19].mxu0 }
 0x4b4   :  { %1074 = vtanh.f32 %v501_v15 }
 0x4bd   :  { %v1073_v19 = vpop.eup %1072 }
 0x4be   :  { %v1075_v20 = vpop.eup %1074  ;;  %v504_v21 = vmul.f32 0.5, %v1073_v19 }
 0x4bf   :  { %v505_v22 = vmul.f32 %v1075_v20, %v1269_v45 }
 0x4c0   :  { %v506_v25 = vadd.f32 0.5, %v504_v21 }
 0x4c1   :  { %v507_v26 = vadd.f32 %v505_v22, %v1271_v49 }
 0x4c2   :  { %v508_v33 = vmul.f32 %v506_v25, %v441_v32 }
 0x4c3   :  { %v509_v27 = vmul.f32 %v507_v26, %v506_v25 }
 0x4c5   :  { %511 = vrot.lane.b32.xlu0 %v509_v27, %s1111_s3 }
 0x4c9   :  { %524 = vperm.xlu0 %1022, %v1256_v24  }
 0x4cd   :  { %1023 = vset.pattern.permute.xlu0 %v1114_v0 }
 0x4ce   :  { %605 = vperm.xlu0 %1023, %v1253_v23  }
 0x537   :  { %v512_v34 = vpop.permute.xlu0 %511 }
 0x538   :  { %v514_v35 = vadd.f32 %v512_v34, %v508_v33 }
 0x53a   :  { %1076 = vtanh.f32 %v514_v35  ;;  %v522_v41 = vmul.f32 %v519_v38, %v514_v35 }
 0x544   :  { %v1077_v36 = vpop.eup %1076 }
 0x545   :  { %v516_v37 = vmul.f32 %v1077_v36, %v507_v26  ;;  %v1116_v36 = vmov 5  }
 0x547   :  { %v1362_v46 = vmul.f32 %v519_v38, %v516_v37  ;;  %v177_v37 = vadd.f32 %v1328_v54, %v1263_v29  ;;  %v179_v38 = vadd.f32 %v1330_v55, %v1265_v30 }
 0x548   :  { %v525_v40 = vpop.permute.xlu0 %524 }
 0x549   :  { %v527_v48 = vmul.f32 %v525_v40, %v441_v32  ;;  %v529_v50 = vmul.f32 %v525_v40, %v1318_v47  ;;  %v173_v47 = vadd.f32 %v1326_v53, %v1265_v30  ;;  %v1115_v53 = vmov 4  }
 0x54a   :  { %1026 = vset.pattern.permute.xlu0 %v1115_v53 }
 0x54b   :  { %v1365_v51 = vadd.f32 %v527_v48, %v522_v41  ;;  %v530_v62 = vadd.f32 %v529_v50, %v1362_v46 }
 0x54d   :  { %v539_v39 = vpack.c.bf16 %v530_v62, %v530_v62  ;;  %v606_v27 = vpop.permute.xlu0 %605 }
 0x54f   :  { %541 = vrot.lane.b32.xlu1 %v539_v39, %s1111_s3 }
 0x5c1   :  { %v542_v42 = vpop.permute.xlu1 %541 }
 0x5c2   :  { %996 = vmatmul.mubr.msk.bf16.vlgmr.msra.gmra.mrb[8].mxu1 %vm109_vm0, %v542_v42 }
 0x5c3   :  { %721 = vmatpush1.bf16.msra.mxu1 %v1167_v4  ;;  %752 = vmatprep.mubr.bf16.mxu1 %v1108_v1 }
 0x5c4   :  { %722 = vmatprep.subr.bf16.mxu1 %v1177_v6 }
 0x5c7   :  { %723 = vmatpush1.bf16.msra.mxu1 %v1185_v8 }
 0x5c8   :  { %724 = vmatprep.subr.bf16.mxu1 %v1194_v10 }
 0x5cb   :  { %725 = vmatpush1.bf16.msra.mxu1 %v1202_v12 }
 0x5cc   :  { %726 = vmatprep.subr.bf16.mxu1 %v1212_v14 }
 0x5cf   :  { %727 = vmatpush1.bf16.msra.mxu1 %v1224_v17 }
 0x5d0   :  { %894 = vmatprep.subr.bf16.mxu1 %v1157_v2 }
 0x695   :  { %v580_v63 = vpop.f32.mrb[8].mxu1 }
 0x696   :  { %v587_v0 = vadd.f32 %v580_v63, %v171_v43  ;;  %v582_v5 = vpop.f32.mrb[9].mxu1 }
 0x697   :  { %v588_v7 = vadd.f32 %v582_v5, %v173_v47  ;;  %v584_v9 = vpop.f32.mrb[10].mxu1 }
 0x698   :  { %1078 = vtanh.f32 %v587_v0  ;;  %v585_v11 = vpop.f32.mrb[11].mxu1 }
 0x699   :  { %1080 = vtanh.f32 %v588_v7 }
 0x6a2   :  { %v1079_v13 = vpop.eup %1078 }
 0x6a3   :  { %v1081_v15 = vpop.eup %1080  ;;  %v591_v16 = vmul.f32 0.5, %v1079_v13 }
 0x6a4   :  { %v592_v18 = vmul.f32 %v1081_v15, %v1269_v45 }
 0x6a5   :  { %v593_v2 = vadd.f32 0.5, %v591_v16 }
 0x6a6   :  { %v594_v19 = vadd.f32 %v592_v18, %v1271_v49 }
 0x6a7   :  { %v595_v20 = vmul.f32 %v593_v2, %v1365_v51 }
 0x6a8   :  { %v596_v52 = vmul.f32 %v594_v19, %v593_v2 }
 0x6aa   :  { %598 = vrot.lane.b32.xlu1 %v596_v52, %s1111_s3 }
 0x6ae   :  { %611 = vperm.xlu1 %1024, %v1256_v24  }
 0x6b2   :  { %1025 = vset.pattern.permute.xlu1 %v1115_v53 }
 0x71c   :  { %v599_v21 = vpop.permute.xlu1 %598 }
 0x71d   :  { %v601_v22 = vadd.f32 %v599_v21, %v595_v20 }
 0x71f   :  { %1082 = vtanh.f32 %v601_v22  ;;  %v609_v7 = vmul.f32 %v606_v27, %v601_v22 }
 0x729   :  { %v1083_v25 = vpop.eup %1082 }
 0x72a   :  { %v603_v26 = vmul.f32 %v1083_v25, %v594_v19 }
 0x72c   :  { %v1388_v31 = vmul.f32 %v606_v27, %v603_v26  ;;  %v181_v27 = vadd.f32 %v1332_v56, %v1263_v29 }
 0x72d   :  { %v612_v28 = vpop.permute.xlu1 %611 }
 0x72e   :  { %v616_v32 = vmul.f32 %v612_v28, %v530_v62  ;;  %v614_v55 = vmul.f32 %v612_v28, %v1365_v51 }
 0x730   :  { %v617_v33 = vadd.f32 %v616_v32, %v1388_v31  ;;  %v615_v9 = vadd.f32 %v614_v55, %v609_v7 }
 0x732   :  { %v626_v34 = vpack.c.bf16 %v617_v33, %v617_v33 }
 0x734   :  { %628 = vrot.lane.b32.xlu1 %v626_v34, %s1111_s3 }
 0x738   :  { %692 = vperm.xlu1 %1025, %v1253_v23  }
 0x73c   :  { %1028 = vset.pattern.permute.xlu1 %v1116_v36 }
 0x7a6   :  { %v629_v35 = vpop.permute.xlu1 %628 }
 0x7a7   :  { %998 = vmatmul.mubr.msk.bf16.vlgmr.msra.gmra.mrb[20].mxu0 %vm109_vm0, %v629_v35 }
 0x7a8   :  { %808 = vmatpush1.bf16.msra.mxu0 %v1167_v4  ;;  %839 = vmatprep.mubr.bf16.mxu0 %v1108_v1 }
 0x7a9   :  { %809 = vmatprep.subr.bf16.mxu0 %v1177_v6 }
 0x7ac   :  { %810 = vmatpush1.bf16.msra.mxu0 %v1185_v8 }
 0x7ad   :  { %811 = vmatprep.subr.bf16.mxu0 %v1194_v10 }
 0x7b0   :  { %812 = vmatpush1.bf16.msra.mxu0 %v1202_v12 }
 0x7b1   :  { %813 = vmatprep.subr.bf16.mxu0 %v1212_v14 }
 0x7b4   :  { %814 = vmatpush1.bf16.msra.mxu0 %v1224_v17 }
 0x7b7   :  { %v693_v2 = vpop.permute.xlu1 %692 }
 0x87a   :  { %v667_v40 = vpop.f32.mrb[20].mxu0 }
 0x87b   :  { %v674_v41 = vadd.f32 %v667_v40, %v177_v37  ;;  %v669_v48 = vpop.f32.mrb[21].mxu0 }
 0x87c   :  { %v675_v50 = vadd.f32 %v669_v48, %v179_v38  ;;  %v671_v62 = vpop.f32.mrb[22].mxu0 }
 0x87d   :  { %1084 = vtanh.f32 %v674_v41  ;;  %v672_v39 = vpop.f32.mrb[23].mxu0 }
 0x87e   :  { %1086 = vtanh.f32 %v675_v50 }
 0x887   :  { %v1085_v42 = vpop.eup %1084 }
 0x888   :  { %v1087_v43 = vpop.eup %1086  ;;  %v678_v47 = vmul.f32 0.5, %v1085_v42 }
 0x889   :  { %v679_v63 = vmul.f32 %v1087_v43, %v1269_v45 }
 0x88a   :  { %v680_v0 = vadd.f32 0.5, %v678_v47 }
 0x88b   :  { %v681_v5 = vadd.f32 %v679_v63, %v1271_v49  ;;  %v187_v63 = vadd.f32 %v1336_v58, %v1263_v29 }
 0x88c   :  { %v682_v11 = vmul.f32 %v680_v0, %v615_v9 }
 0x88d   :  { %v683_v54 = vmul.f32 %v681_v5, %v680_v0  ;;  %v189_v0 = vadd.f32 %v1338_v59, %v1265_v30  ;;  %v1118_v59 = vmov 7  }
 0x88f   :  { %685 = vrot.lane.b32.xlu0 %v683_v54, %s1111_s3 }
 0x893   :  { %698 = vperm.xlu0 %1026, %v1256_v24  }
 0x897   :  { %1027 = vset.pattern.permute.xlu0 %v1116_v36 }
 0x898   :  { %779 = vperm.xlu0 %1027, %v1253_v23  }
 0x901   :  { %v686_v13 = vpop.permute.xlu0 %685 }
 0x902   :  { %v688_v15 = vadd.f32 %v686_v13, %v682_v11 }
 0x904   :  { %1088 = vtanh.f32 %v688_v15  ;;  %v696_v52 = vmul.f32 %v693_v2, %v688_v15 }
 0x90e   :  { %v1089_v16 = vpop.eup %1088 }
 0x90f   :  { %v690_v18 = vmul.f32 %v1089_v16, %v681_v5 }
 0x911   :  { %v1412_v53 = vmul.f32 %v693_v2, %v690_v18 }
 0x912   :  { %v699_v19 = vpop.permute.xlu0 %698 }
 0x913   :  { %v701_v20 = vmul.f32 %v699_v19, %v615_v9  ;;  %v703_v21 = vmul.f32 %v699_v19, %v617_v33 }
 0x915   :  { %v1414_v25 = vadd.f32 %v701_v20, %v696_v52  ;;  %v704_v26 = vadd.f32 %v703_v21, %v1412_v53 }
 0x917   :  { %v713_v51 = vpack.c.bf16 %v704_v26, %v704_v26  ;;  %v780_v48 = vpop.permute.xlu0 %779 }
 0x919   :  { %715 = vrot.lane.b32.xlu1 %v713_v51, %s1111_s3 }
 0x98b   :  { %v716_v22 = vpop.permute.xlu1 %715 }
 0x98c   :  { %1000 = vmatmul.mubr.msk.bf16.vlgmr.msra.gmra.mrb[12].mxu1 %vm109_vm0, %v716_v22 }
 0x98d   :  { %895 = vmatpush1.bf16.msra.mxu1 %v1167_v4  ;;  %926 = vmatprep.mubr.bf16.mxu1 %v1108_v1  ;;  %v183_v4 = vadd.f32 %v1334_v57, %v1265_v30  ;;  %v1117_v57 = vmov 6  }
 0x98e   :  { %896 = vmatprep.subr.bf16.mxu1 %v1177_v6  ;;  %1030 = vset.pattern.permute.xlu0 %v1117_v57 }
 0x991   :  { %897 = vmatpush1.bf16.msra.mxu1 %v1185_v8 }
 0x992   :  { %898 = vmatprep.subr.bf16.mxu1 %v1194_v10 }
 0x995   :  { %899 = vmatpush1.bf16.msra.mxu1 %v1202_v12 }
 0x996   :  { %900 = vmatprep.subr.bf16.mxu1 %v1212_v14 }
 0x999   :  { %901 = vmatpush1.bf16.msra.mxu1 %v1224_v17 }
 0xa5f   :  { %v754_v28 = vpop.f32.mrb[12].mxu1 }
 0xa60   :  { %v761_v1 = vadd.f32 %v754_v28, %v181_v27  ;;  %v756_v32 = vpop.f32.mrb[13].mxu1 }
 0xa61   :  { %v762_v6 = vadd.f32 %v756_v32, %v183_v4  ;;  %v758_v33 = vpop.f32.mrb[14].mxu1 }
 0xa62   :  { %1090 = vtanh.f32 %v761_v1  ;;  %v759_v8 = vpop.f32.mrb[15].mxu1 }
 0xa63   :  { %1092 = vtanh.f32 %v762_v6 }
 0xa6c   :  { %v1091_v10 = vpop.eup %1090 }
 0xa6d   :  { %v1093_v12 = vpop.eup %1092  ;;  %v765_v34 = vmul.f32 0.5, %v1091_v10 }
 0xa6e   :  { %v766_v14 = vmul.f32 %v1093_v12, %v1269_v45 }
 0xa6f   :  { %v767_v17 = vadd.f32 0.5, %v765_v34 }
 0xa70   :  { %v768_v35 = vadd.f32 %v766_v14, %v1271_v49  ;;  %v191_v14 = vadd.f32 %v1340_v60, %v1263_v29 }
 0xa71   :  { %v769_v36 = vmul.f32 %v767_v17, %v1414_v25 }
 0xa72   :  { %v770_v56 = vmul.f32 %v768_v35, %v767_v17  ;;  %v193_v17 = vadd.f32 %v1342_v61, %v1265_v30 }
 0xa74   :  { %772 = vrot.lane.b32.xlu1 %v770_v56, %s1111_s3 }
 0xa78   :  { %785 = vperm.xlu1 %1028, %v1256_v24  }
 0xa7c   :  { %1029 = vset.pattern.permute.xlu1 %v1117_v57 }
 0xae6   :  { %v773_v37 = vpop.permute.xlu1 %772 }
 0xae7   :  { %v775_v38 = vadd.f32 %v773_v37, %v769_v36 }
 0xae9   :  { %1094 = vtanh.f32 %v775_v38  ;;  %v783_v20 = vmul.f32 %v780_v48, %v775_v38 }
 0xaf3   :  { %v1095_v40 = vpop.eup %1094 }
 0xaf4   :  { %v777_v41 = vmul.f32 %v1095_v40, %v768_v35 }
 0xaf6   :  { %v1436_v62 = vmul.f32 %v780_v48, %v777_v41 }
 0xaf7   :  { %v786_v50 = vpop.permute.xlu1 %785 }
 0xaf8   :  { %v790_v39 = vmul.f32 %v786_v50, %v704_v26  ;;  %v788_v52 = vmul.f32 %v786_v50, %v1414_v25 }
 0xafa   :  { %v791_v42 = vadd.f32 %v790_v39, %v1436_v62  ;;  %v789_v21 = vadd.f32 %v788_v52, %v783_v20 }
 0xafc   :  { %v800_v43 = vpack.c.bf16 %v791_v42, %v791_v42 }
 0xafe   :  { %802 = vrot.lane.b32.xlu1 %v800_v43, %s1111_s3 }
 0xb02   :  { %866 = vperm.xlu1 %1029, %v1253_v23  }
 0xb70   :  { %v803_v47 = vpop.permute.xlu1 %802 }
 0xb71   :  { %1002 = vmatmul.mubr.msk.bf16.vlgmr.msra.gmra.mrb[24].mxu0 %vm109_vm0, %v803_v47 }
 0xb81   :  { %v867_v4 = vpop.permute.xlu1 %866 }
 0xc44   :  { %v841_v5 = vpop.f32.mrb[24].mxu0 }
 0xc45   :  { %v848_v54 = vadd.f32 %v841_v5, %v187_v63  ;;  %v843_v55 = vpop.f32.mrb[25].mxu0 }
 0xc46   :  { %v849_v7 = vadd.f32 %v843_v55, %v189_v0  ;;  %v845_v9 = vpop.f32.mrb[26].mxu0 }
 0xc47   :  { %1096 = vtanh.f32 %v848_v54  ;;  %v846_v11 = vpop.f32.mrb[27].mxu0 }
 0xc48   :  { %1098 = vtanh.f32 %v849_v7 }
 0xc51   :  { %v1097_v13 = vpop.eup %1096 }
 0xc52   :  { %v1099_v15 = vpop.eup %1098  ;;  %v852_v16 = vmul.f32 0.5, %v1097_v13 }
 0xc53   :  { %v853_v18 = vmul.f32 %v1099_v15, %v1269_v45 }
 0xc54   :  { %v854_v2 = vadd.f32 0.5, %v852_v16 }
 0xc55   :  { %v855_v19 = vadd.f32 %v853_v18, %v1271_v49 }
 0xc56   :  { %v856_v26 = vmul.f32 %v854_v2, %v789_v21 }
 0xc57   :  { %v857_v58 = vmul.f32 %v855_v19, %v854_v2 }
 0xc59   :  { %859 = vrot.lane.b32.xlu0 %v857_v58, %s1111_s3 }
 0xc5d   :  { %872 = vperm.xlu0 %1030, %v1256_v24  }
 0xc61   :  { %1031 = vset.pattern.permute.xlu0 %v1118_v59 }
 0xc62   :  { %953 = vperm.xlu0 %1031, %v1253_v23  }
 0xc66   :  { %532 = vrot.lane.b32.xlu0 %v1362_v46, %s1111_s3 }
 0xc6a   :  { %706 = vrot.lane.b32.xlu0 %v1412_v53, %s1111_s3 }
 0xccb   :  { %v860_v51 = vpop.permute.xlu0 %859 }
 0xccc   :  { %v862_v22 = vadd.f32 %v860_v51, %v856_v26 }
 0xcce   :  { %1100 = vtanh.f32 %v862_v22  ;;  %v870_v23 = vmul.f32 %v867_v4, %v862_v22 }
 0xcd8   :  { %v1101_v27 = vpop.eup %1100 }
 0xcd9   :  { %v864_v24 = vmul.f32 %v1101_v27, %v855_v19 }
 0xcdb   :  { %v869_v28 = vmul.f32 %v867_v4, %v864_v24 }
 0xcdc   :  { %v873_v1 = vpop.permute.xlu0 %872 }
 0xcdd   :  { %v875_v32 = vmul.f32 %v873_v1, %v789_v21  ;;  %v877_v6 = vmul.f32 %v873_v1, %v791_v42  ;;  %880 = vrot.lane.b32.xlu0 %v869_v28, %s1111_s3 }
 0xcdf   :  { %v876_v46 = vadd.f32 %v875_v32, %v870_v23  ;;  %v878_v53 = vadd.f32 %v877_v6, %v869_v28 }
 0xce1   :  { %v954_v33 = vpop.permute.xlu0 %953  ;;  %v887_v25 = vpack.c.bf16 %v878_v53, %v878_v53 }
 0xce3   :  { %889 = vrot.lane.b32.xlu1 %v887_v25, %s1111_s3 }
 0xce5   :  { %v533_v8 = vpop.permute.xlu0 %532 }
 0xce6   :  { %995 = vst.msk [vmem:[%s1512_s5 + $0x10] sm:$0xff] %vm109_vm0, %v533_v8 }
 0xce9   :  { %v707_v10 = vpop.permute.xlu0 %706 }
 0xcea   :  { %999 = vst.msk [vmem:[%s1512_s5 + $0x20] sm:$0xff] %vm109_vm0, %v707_v10 }
 0xd4f   :  { %v881_v12 = vpop.permute.xlu0 %880 }
 0xd50   :  { %1003 = vst.msk [vmem:[%s1512_s5 + $0x30] sm:$0xff] %vm109_vm0, %v881_v12 }
 0xd55   :  { %v890_v34 = vpop.permute.xlu1 %889 }
 0xd56   :  { %1004 = vmatmul.mubr.msk.bf16.vlgmr.msra.gmra.mrb[16].mxu1 %vm109_vm0, %v890_v34 }
 0xe29   :  { %v928_v35 = vpop.f32.mrb[16].mxu1 }
 0xe2a   :  { %v935_v56 = vadd.f32 %v928_v35, %v191_v14  ;;  %v930_v57 = vpop.f32.mrb[17].mxu1 }
 0xe2b   :  { %v936_v36 = vadd.f32 %v930_v57, %v193_v17  ;;  %v932_v37 = vpop.f32.mrb[18].mxu1 }
 0xe2c   :  { %1102 = vtanh.f32 %v935_v56  ;;  %v933_v38 = vpop.f32.mrb[19].mxu1 }
 0xe2d   :  { %1104 = vtanh.f32 %v936_v36 }
 0xe36   :  { %v1103_v40 = vpop.eup %1102 }
 0xe37   :  { %v1105_v41 = vpop.eup %1104  ;;  %v939_v48 = vmul.f32 0.5, %v1103_v40 }
 0xe38   :  { %v940_v50 = vmul.f32 %v1105_v41, %v1269_v45 }
 0xe39   :  { %v941_v39 = vadd.f32 0.5, %v939_v48 }
 0xe3a   :  { %v942_v42 = vadd.f32 %v940_v50, %v1271_v49 }
 0xe3b   :  { %v943_v29 = vmul.f32 %v941_v39, %v876_v46 }
 0xe3c   :  { %v944_v60 = vmul.f32 %v942_v42, %v941_v39 }
 0xe3e   :  { %946 = vrot.lane.b32.xlu1 %v944_v60, %s1111_s3 }
 0xe42   :  { %359 = vrot.lane.b32.xlu1 %v1278_v3, %s1111_s3 }
 0xe46   :  { %445 = vrot.lane.b32.xlu1 %v1315_v44, %s1111_s3 }
 0xe4a   :  { %619 = vrot.lane.b32.xlu1 %v1388_v31, %s1111_s3 }
 0xe4e   :  { %793 = vrot.lane.b32.xlu1 %v1436_v62, %s1111_s3 }
 0xeb0   :  { %v947_v30 = vpop.permute.xlu1 %946 }
 0xeb1   :  { %v949_v45 = vadd.f32 %v947_v30, %v943_v29 }
 0xeb3   :  { %1106 = vtanh.f32 %v949_v45 }
 0xeb4   :  { %v360_v49 = vpop.permute.xlu1 %359 }
 0xeb5   :  { %362 = vst.msk [vmem:[%s1512_s5] sm:$0xff] %vm109_vm0, %v360_v49 }
 0xeb8   :  { %v446_v61 = vpop.permute.xlu1 %445 }
 0xeb9   :  { %993 = vst.msk [vmem:[%s1512_s5 + $0x8] sm:$0xff] %vm109_vm0, %v446_v61 }
 0xebc   :  { %v620_v3 = vpop.permute.xlu1 %619 }
 0xebd   :  { %v1107_v44 = vpop.eup %1106  ;;  %997 = vst.msk [vmem:[%s1512_s5 + $0x18] sm:$0xff] %vm109_vm0, %v620_v3 }
 0xebe   :  { %v951_v31 = vmul.f32 %v1107_v44, %v942_v42 }
 0xec0   :  { %v794_v62 = vpop.permute.xlu1 %793  ;;  %v956_v43 = vmul.f32 %v954_v33, %v951_v31 }
 0xec1   :  { %1001 = vst.msk [vmem:[%s1512_s5 + $0x28] sm:$0xff] %vm109_vm0, %v794_v62 }
 0xec2   :  { %958 = vrot.lane.b32.xlu1 %v956_v43, %s1111_s3 }
 0xf34   :  { %v959_v47 = vpop.permute.xlu1 %958 }
 0xf35   :  { %1005 = vst.msk [vmem:[%s1512_s5 + $0x38] sm:$0xff] %vm109_vm0, %v959_v47 }

</bundles_post_ra>
